<compile_context>
chip_gen: v7x
topology: tpu7x:2x2x1
jax: 0.10.0
libtpu: 0.0.40
codegen_flags: <defaults>
</compile_context>

<pallas_src>
import functools

import jax
import jax.numpy as jnp
from jax.experimental import pallas as pl
from jax.experimental.pallas import tpu as pltpu


def fused_block_kernel(x_ref, a1_ref, b1_ref, a2_ref, b2_ref, o_ref):
    """Fused valid-3x3-conv+ReLU -> valid-3x3-conv+ReLU, lane-dense layout.

    x_ref : (1, H,  W*Cin)   one image; NHWC rows flattened channel-minor.
    a1_ref: (3, W*Cin, W*C1) conv1 block-band weights, one per kh tap
                             (kw and cin folded into the contraction axis).
    b1_ref: (1, W*C1)        conv1 bias tiled across the W output columns.
    a2_ref: (3, W*C1, W*C2)  conv2 block-band weights, one per kh tap.
    b2_ref: (1, W*C2)        conv2 bias tiled across the W output columns.
    o_ref : (1, H-4, W*C2)   lane-dense output rows (junk right-edge columns
                             j >= W-4 included; dropped by the wrapper).
    """
    H = x_ref.shape[1]
    Ho1 = H - 2                       # conv1 output rows
    Ho2 = H - 4                       # conv2 output rows

    x = x_ref[0]                      # (H, W*Cin)  bf16 (or f32 check path)

    # ---- conv1 + bias + ReLU: one lane-dense matmul per kh tap ------------
    # kw & cin are fused into K by the block-band weight, so the reduction
    # stays inside the MXU; only 3 accumulator adds remain (tiny, f32).
    acc1 = jnp.dot(x[0:Ho1], a1_ref[0], preferred_element_type=jnp.float32)
    acc1 = acc1 + jnp.dot(x[1:Ho1 + 1], a1_ref[1],
                          preferred_element_type=jnp.float32)
    acc1 = acc1 + jnp.dot(x[2:Ho1 + 2], a1_ref[2],
                          preferred_element_type=jnp.float32)
    # Lane-dense intermediate, register/VMEM resident; never written to HBM.
    h = jnp.maximum(acc1 + b1_ref[...], 0.0).astype(x.dtype)   # (Ho1, W*C1)

    # ---- conv2 + bias + ReLU: same structure, K = W*C1 (128 lanes) --------
    acc2 = jnp.dot(h[0:Ho2], a2_ref[0], preferred_element_type=jnp.float32)
    acc2 = acc2 + jnp.dot(h[1:Ho2 + 1], a2_ref[1],
                          preferred_element_type=jnp.float32)
    acc2 = acc2 + jnp.dot(h[2:Ho2 + 2], a2_ref[2],
                          preferred_element_type=jnp.float32)
    # Lane-dense store: last dim W*C2 (= 128 at test shape) -> unmasked vst.
    o_ref[0] = jnp.maximum(acc2 + b2_ref[...], 0.0).astype(o_ref.dtype)


def _band_weights(w_hwio, width, dtype):
    """Fold the (kw, cin) taps of a 3x3 HWIO conv weight into per-kh
    block-band matrices: A_kh[(j+kw)*Cin + c, j*Cout + o] = w[kh, kw, c, o].
    Built once in the wrapper (hoisted); (3, W*Cin, W*Cout)."""
    w = w_hwio.astype(jnp.float32)
    mats = []
    for kh in range(3):
        m = 0.0
        for kw in range(3):
            shift = jnp.eye(width, width, -kw, dtype=jnp.float32)
            m = m + jnp.kron(shift, w[kh, kw])
        mats.append(m)
    return jnp.stack(mats).astype(dtype)


def block_forward(x_nchw, w1, b1, w2, b2, *, compute_dtype=jnp.bfloat16):
    """Pallas equivalent of Block.forward. x_nchw: (N, Cin, H, W); NCHW in/out.

    w1: (3, 3, Cin, C1) HWIO, b1: (C1,), w2: (3, 3, C1, C2) HWIO, b2: (C2,).
    compute_dtype: MXU operand dtype (bf16 for perf, f32 for tight checks);
                   accumulation is always f32.
    """
    N, Cin, H, W = x_nchw.shape
    C1, C2 = w1.shape[-1], w2.shape[-1]
    Ho2, Wo2 = H - 4, W - 4
    assert H >= 5 and W >= 5, "Block needs >= 5x5 input (two valid 3x3 convs)"

    # NCHW -> NHWC -> lane-dense rows (N, H, W*Cin); channel-minor per pixel.
    x_rows = jnp.transpose(x_nchw, (0, 2, 3, 1)).reshape(N, H, W * Cin)
    x_rows = x_rows.astype(compute_dtype)

    # Hoisted one-time weight/bias prep (kw & cin folded into K; bias tiled
    # across output columns so the in-kernel add is a plain lane-dense add).
    a1 = _band_weights(w1, W, compute_dtype)          # (3, W*Cin, W*C1)
    a2 = _band_weights(w2, W, compute_dtype)          # (3, W*C1,  W*C2)
    b1r = jnp.tile(b1.astype(jnp.float32), W).reshape(1, W * C1)
    b2r = jnp.tile(b2.astype(jnp.float32), W).reshape(1, W * C2)

    out_rows = pl.pallas_call(
        fused_block_kernel,
        out_shape=jax.ShapeDtypeStruct((N, Ho2, W * C2), jnp.float32),
        grid=(N,),
        in_specs=[
            pl.BlockSpec((1, H, W * Cin), lambda n: (n, 0, 0)),
            pl.BlockSpec((3, W * Cin, W * C1), lambda n: (0, 0, 0)),
            pl.BlockSpec((1, W * C1), lambda n: (0, 0)),
            pl.BlockSpec((3, W * C1, W * C2), lambda n: (0, 0, 0)),
            pl.BlockSpec((1, W * C2), lambda n: (0, 0)),
        ],
        out_specs=pl.BlockSpec((1, Ho2, W * C2), lambda n: (n, 0, 0)),
        compiler_params=pltpu.CompilerParams(
            # "parallel" lets v7x's 2 TCs split the batch; on single-TC
            # v5e/v6e the N=2 loop overhead (~0.7 us) is negligible here.
            dimension_semantics=("parallel",),
            # Ample headroom at these shapes; re-derive alongside banding.
            vmem_limit_bytes=32 * 1024 * 1024),
    )(x_rows, a1, b1r, a2, b2r)

    # Un-flatten columns, drop the junk right-edge columns (j >= Wo2), NCHW.
    out = out_rows.reshape(N, Ho2, W, C2)[:, :, :Wo2, :]
    return jnp.transpose(out, (0, 3, 1, 2))


def _reference_block(x_nchw, w1, b1, w2, b2):
    """Plain-JAX reference (matches PyTorch semantics) for verification."""
    def conv(x, w_hwio, b):
        w_oihw = jnp.transpose(w_hwio, (3, 2, 0, 1))
        y = jax.lax.conv_general_dilated(
            x, w_oihw, window_strides=(1, 1), padding="VALID",
            dimension_numbers=("NCHW", "OIHW", "NCHW"))
        return jax.nn.relu(y + b.reshape(1, -1, 1, 1))
    return conv(conv(x_nchw, w1, b1), w2, b2)


if __name__ == "__main__":
    # Small shapes consistent with the module: Block(in_ch=3, ot_ch=8).
    N, Cin, Cout, H, W = 2, 3, 8, 16, 16

    key = jax.random.PRNGKey(0)
    kx, k1, k2, k3, k4 = jax.random.split(key, 5)

    x = jax.random.normal(kx, (N, Cin, H, W), dtype=jnp.float32)
    # Deterministic synthetic parameters (HWIO layout for the kernel).
    w1 = jax.random.normal(k1, (3, 3, Cin, Cout), dtype=jnp.float32) * 0.1
    b1 = jax.random.normal(k2, (Cout,), dtype=jnp.float32) * 0.1
    w2 = jax.random.normal(k3, (3, 3, Cout, Cout), dtype=jnp.float32) * 0.1
    b2 = jax.random.normal(k4, (Cout,), dtype=jnp.float32) * 0.1

    ref = jax.block_until_ready(_reference_block(x, w1, b1, w2, b2))

    # 1) f32-operand path: tight structural check against the f32 reference.
    out_f32 = jax.block_until_ready(
        jax.jit(functools.partial(block_forward, compute_dtype=jnp.float32))(
            x, w1, b1, w2, b2))
    assert out_f32.shape == (N, Cout, H - 4, W - 4), out_f32.shape
    err_f32 = float(jnp.max(jnp.abs(out_f32 - ref)))
    assert err_f32 < 1e-4, err_f32

    # 2) bf16-operand perf path: MXU operands are bf16 (f32 accumulation),
    #    so the tolerance against the f32 reference is relaxed accordingly.
    out_bf16 = jax.block_until_ready(
        jax.jit(functools.partial(block_forward, compute_dtype=jnp.bfloat16))(
            x, w1, b1, w2, b2))
    assert out_bf16.shape == (N, Cout, H - 4, W - 4), out_bf16.shape
    err_bf16 = float(jnp.max(jnp.abs(out_bf16 - ref)))
    assert err_bf16 < 5e-2, err_bf16

    print("KERNEL_OK")
</pallas_src>

<mosaic_0001>
module attributes {stable_mosaic.version = 11 : i64} {
  func.func @fused_block_kernel(%arg0: i32, %arg1: memref<1x16x48xf32, #tpu.memory_space<vmem>>, %arg2: memref<3x48x128xf32, #tpu.memory_space<vmem>>, %arg3: memref<1x128xf32, #tpu.memory_space<vmem>>, %arg4: memref<3x128x128xf32, #tpu.memory_space<vmem>>, %arg5: memref<1x128xf32, #tpu.memory_space<vmem>>, %arg6: memref<1x12x128xf32, #tpu.memory_space<vmem>>) attributes {dimension_semantics = [#tpu.dimension_semantics<parallel>], iteration_bounds = array<i64: 2>, scalar_prefetch = 0 : i64, scratch_operands = 0 : i64, tpu.core_type = #tpu.core_type<tc>, window_params = [{transform_indices = @transform_0, window_bounds = array<i64: 1, 16, 48>}, {pipeline_mode = #tpu.pipeline_mode<synchronous>, transform_indices = @transform_1, window_bounds = array<i64: 3, 48, 128>}, {pipeline_mode = #tpu.pipeline_mode<synchronous>, transform_indices = @transform_2, window_bounds = array<i64: 1, 128>}, {pipeline_mode = #tpu.pipeline_mode<synchronous>, transform_indices = @transform_3, window_bounds = array<i64: 3, 128, 128>}, {pipeline_mode = #tpu.pipeline_mode<synchronous>, transform_indices = @transform_4, window_bounds = array<i64: 1, 128>}, {transform_indices = @transform_5, window_bounds = array<i64: 1, 12, 128>}]} {
    %c0 = arith.constant 0 : index
    %c0_0 = arith.constant 0 : index
    %c0_1 = arith.constant 0 : index
    %0 = vector.load %arg1[%c0, %c0_0, %c0_1] : memref<1x16x48xf32, #tpu.memory_space<vmem>>, vector<1x16x48xf32>
    %1 = vector.shape_cast %0 : vector<1x16x48xf32> to vector<16x48xf32>
    %2 = vector.extract_strided_slice %1 {offsets = [0, 0], sizes = [14, 48], strides = [1, 1]} : vector<16x48xf32> to vector<14x48xf32>
    %c0_2 = arith.constant 0 : index
    %c0_3 = arith.constant 0 : index
    %c0_4 = arith.constant 0 : index
    %3 = vector.load %arg2[%c0_2, %c0_3, %c0_4] : memref<3x48x128xf32, #tpu.memory_space<vmem>>, vector<1x48x128xf32>
    %4 = vector.shape_cast %3 : vector<1x48x128xf32> to vector<48x128xf32>
    %cst = arith.constant dense<0.000000e+00> : vector<14x128xf32>
    %5 = tpu.matmul %2, %4, %cst {dimension_numbers = #tpu.dot_dimension_numbers<[1], [0], [0], [1], [0, 0, 1, 1], [], []>} : vector<14x48xf32>, vector<48x128xf32>, vector<14x128xf32> -> vector<14x128xf32>
    %6 = vector.extract_strided_slice %1 {offsets = [1, 0], sizes = [14, 48], strides = [1, 1]} : vector<16x48xf32> to vector<14x48xf32>
    %c1 = arith.constant 1 : index
    %c0_5 = arith.constant 0 : index
    %c0_6 = arith.constant 0 : index
    %7 = vector.load %arg2[%c1, %c0_5, %c0_6] : memref<3x48x128xf32, #tpu.memory_space<vmem>>, vector<1x48x128xf32>
    %8 = vector.shape_cast %7 : vector<1x48x128xf32> to vector<48x128xf32>
    %cst_7 = arith.constant dense<0.000000e+00> : vector<14x128xf32>
    %9 = tpu.matmul %6, %8, %cst_7 {dimension_numbers = #tpu.dot_dimension_numbers<[1], [0], [0], [1], [0, 0, 1, 1], [], []>} : vector<14x48xf32>, vector<48x128xf32>, vector<14x128xf32> -> vector<14x128xf32>
    %10 = arith.addf %5, %9 : vector<14x128xf32>
    %11 = vector.extract_strided_slice %1 {offsets = [2, 0], sizes = [14, 48], strides = [1, 1]} : vector<16x48xf32> to vector<14x48xf32>
    %c2 = arith.constant 2 : index
    %c0_8 = arith.constant 0 : index
    %c0_9 = arith.constant 0 : index
    %12 = vector.load %arg2[%c2, %c0_8, %c0_9] : memref<3x48x128xf32, #tpu.memory_space<vmem>>, vector<1x48x128xf32>
    %13 = vector.shape_cast %12 : vector<1x48x128xf32> to vector<48x128xf32>
    %cst_10 = arith.constant dense<0.000000e+00> : vector<14x128xf32>
    %14 = tpu.matmul %11, %13, %cst_10 {dimension_numbers = #tpu.dot_dimension_numbers<[1], [0], [0], [1], [0, 0, 1, 1], [], []>} : vector<14x48xf32>, vector<48x128xf32>, vector<14x128xf32> -> vector<14x128xf32>
    %15 = arith.addf %10, %14 : vector<14x128xf32>
    %c0_11 = arith.constant 0 : index
    %c0_12 = arith.constant 0 : index
    %16 = vector.load %arg3[%c0_11, %c0_12] : memref<1x128xf32, #tpu.memory_space<vmem>>, vector<1x128xf32>
    %17 = vector.broadcast %16 : vector<1x128xf32> to vector<14x128xf32>
    %18 = arith.addf %15, %17 : vector<14x128xf32>
    %cst_13 = arith.constant 0.000000e+00 : f32
    %19 = vector.broadcast %cst_13 : f32 to vector<14x128xf32>
    %20 = arith.maximumf %18, %19 : vector<14x128xf32>
    %21 = vector.extract_strided_slice %20 {offsets = [0, 0], sizes = [12, 128], strides = [1, 1]} : vector<14x128xf32> to vector<12x128xf32>
    %c0_14 = arith.constant 0 : index
    %c0_15 = arith.constant 0 : index
    %c0_16 = arith.constant 0 : index
    %22 = vector.load %arg4[%c0_14, %c0_15, %c0_16] : memref<3x128x128xf32, #tpu.memory_space<vmem>>, vector<1x128x128xf32>
    %23 = vector.shape_cast %22 : vector<1x128x128xf32> to vector<128x128xf32>
    %cst_17 = arith.constant dense<0.000000e+00> : vector<12x128xf32>
    %24 = tpu.matmul %21, %23, %cst_17 {dimension_numbers = #tpu.dot_dimension_numbers<[1], [0], [0], [1], [0, 0, 1, 1], [], []>} : vector<12x128xf32>, vector<128x128xf32>, vector<12x128xf32> -> vector<12x128xf32>
    %25 = vector.extract_strided_slice %20 {offsets = [1, 0], sizes = [12, 128], strides = [1, 1]} : vector<14x128xf32> to vector<12x128xf32>
    %c1_18 = arith.constant 1 : index
    %c0_19 = arith.constant 0 : index
    %c0_20 = arith.constant 0 : index
    %26 = vector.load %arg4[%c1_18, %c0_19, %c0_20] : memref<3x128x128xf32, #tpu.memory_space<vmem>>, vector<1x128x128xf32>
    %27 = vector.shape_cast %26 : vector<1x128x128xf32> to vector<128x128xf32>
    %cst_21 = arith.constant dense<0.000000e+00> : vector<12x128xf32>
    %28 = tpu.matmul %25, %27, %cst_21 {dimension_numbers = #tpu.dot_dimension_numbers<[1], [0], [0], [1], [0, 0, 1, 1], [], []>} : vector<12x128xf32>, vector<128x128xf32>, vector<12x128xf32> -> vector<12x128xf32>
    %29 = arith.addf %24, %28 : vector<12x128xf32>
    %30 = vector.extract_strided_slice %20 {offsets = [2, 0], sizes = [12, 128], strides = [1, 1]} : vector<14x128xf32> to vector<12x128xf32>
    %c2_22 = arith.constant 2 : index
    %c0_23 = arith.constant 0 : index
    %c0_24 = arith.constant 0 : index
    %31 = vector.load %arg4[%c2_22, %c0_23, %c0_24] : memref<3x128x128xf32, #tpu.memory_space<vmem>>, vector<1x128x128xf32>
    %32 = vector.shape_cast %31 : vector<1x128x128xf32> to vector<128x128xf32>
    %cst_25 = arith.constant dense<0.000000e+00> : vector<12x128xf32>
    %33 = tpu.matmul %30, %32, %cst_25 {dimension_numbers = #tpu.dot_dimension_numbers<[1], [0], [0], [1], [0, 0, 1, 1], [], []>} : vector<12x128xf32>, vector<128x128xf32>, vector<12x128xf32> -> vector<12x128xf32>
    %34 = arith.addf %29, %33 : vector<12x128xf32>
    %c0_26 = arith.constant 0 : index
    %c0_27 = arith.constant 0 : index
    %35 = vector.load %arg5[%c0_26, %c0_27] : memref<1x128xf32, #tpu.memory_space<vmem>>, vector<1x128xf32>
    %36 = vector.broadcast %35 : vector<1x128xf32> to vector<12x128xf32>
    %37 = arith.addf %34, %36 : vector<12x128xf32>
    %cst_28 = arith.constant 0.000000e+00 : f32
    %38 = vector.broadcast %cst_28 : f32 to vector<12x128xf32>
    %39 = arith.maximumf %37, %38 : vector<12x128xf32>
    %c0_29 = arith.constant 0 : index
    %c0_30 = arith.constant 0 : index
    %c0_31 = arith.constant 0 : index
    %40 = vector.load %arg6[%c0_29, %c0_30, %c0_31] : memref<1x12x128xf32, #tpu.memory_space<vmem>>, vector<1x12x128xf32>
    %41 = vector.shape_cast %40 : vector<1x12x128xf32> to vector<12x128xf32>
    %42 = vector.shape_cast %39 : vector<12x128xf32> to vector<1x12x128xf32>
    tpu.vector_store %arg6[%c0_29, %c0_30, %c0_31], %42 {strides = array<i32>} : memref<1x12x128xf32, #tpu.memory_space<vmem>>, vector<1x12x128xf32>,
    return
  }
  func.func @transform_0(%arg0: i32) -> (i32, i32, i32) {
    %c0_i32 = arith.constant 0 : i32
    %c0_i32_0 = arith.constant 0 : i32
    %c0_i32_1 = arith.constant 0 : i32
    return %arg0, %c0_i32, %c0_i32_0 : i32, i32, i32
  }
  func.func @transform_1(%arg0: i32) -> (i32, i32, i32) {
    %c0_i32 = arith.constant 0 : i32
    %c0_i32_0 = arith.constant 0 : i32
    %c0_i32_1 = arith.constant 0 : i32
    %c0_i32_2 = arith.constant 0 : i32
    return %c0_i32, %c0_i32_0, %c0_i32_1 : i32, i32, i32
  }
  func.func @transform_2(%arg0: i32) -> (i32, i32) {
    %c0_i32 = arith.constant 0 : i32
    %c0_i32_0 = arith.constant 0 : i32
    %c0_i32_1 = arith.constant 0 : i32
    return %c0_i32, %c0_i32_0 : i32, i32
  }
  func.func @transform_3(%arg0: i32) -> (i32, i32, i32) {
    %c0_i32 = arith.constant 0 : i32
    %c0_i32_0 = arith.constant 0 : i32
    %c0_i32_1 = arith.constant 0 : i32
    %c0_i32_2 = arith.constant 0 : i32
    return %c0_i32, %c0_i32_0, %c0_i32_1 : i32, i32, i32
  }
  func.func @transform_4(%arg0: i32) -> (i32, i32) {
    %c0_i32 = arith.constant 0 : i32
    %c0_i32_0 = arith.constant 0 : i32
    %c0_i32_1 = arith.constant 0 : i32
    return %c0_i32, %c0_i32_0 : i32, i32
  }
  func.func @transform_5(%arg0: i32) -> (i32, i32, i32) {
    %c0_i32 = arith.constant 0 : i32
    %c0_i32_0 = arith.constant 0 : i32
    %c0_i32_1 = arith.constant 0 : i32
    return %arg0, %c0_i32, %c0_i32_0 : i32, i32, i32
  }
}

</mosaic_0001>

<bundles_post_ra>
// kernel: tile.13
= control target key start
LH: loop header
LB: loop body
LE: loop exit
PB: predicated region body
PF: predicated region fallthrough
CT: control target
= control target key end

     0   :  { %s28_s0 = inlined_call_operand.vmem [shape: f32[8], index: 0, kind: input, shape index: {}]   ;;  %s29_s1 = inlined_call_operand.vmem [shape: f32[16,8], index: 1, kind: output, shape index: {}]  }
   0x1   :  { %v4_v0 = vld [vmem:[%s28_s0] ss:$0 sm:$0xff] }
   0x2   :  { %5 = vst [vmem:[%s29_s1] sm:$0xff] %v4_v0  ;;  %8 = vst [vmem:[%s29_s1 + $0x8] sm:$0xff] %v4_v0 }

// kernel: tile.14
= control target key start
LH: loop header
LB: loop body
LE: loop exit
PB: predicated region body
PF: predicated region fallthrough
CT: control target
= control target key end

     0   :  { %s131_s10 = smov 120   ;;  %s132_s11 = smov 104   ;;  %vm3_vm0 = vcmask 64512   ;;  %vm9_vm1 = vcmask 1048512   ;;  %vm15_vm2 = vcmask 982912   ;;  %vm21_vm3 = vcmask 917312   ;;  %s207_s0 = inlined_call_operand.vmem [shape: f32[16,8], index: 0, kind: input, shape index: {}]   ;;  %s208_s1 = inlined_call_operand.vmem [shape: f32[1,128], index: 1, kind: output, shape index: {}]  }
   0x1   :  { %v101_v0 = vld [vmem:[%s207_s0 + $0xf] sm:$0x1]   ;;  %v103_v1 = vld [vmem:[%s207_s0 + $0xd] sm:$0x1]   ;;  %v102_v2 = vld [vmem:[%s207_s0 + $0xe] sm:$0x1]  }
   0x2   :  { %7 = vrot.lane.b32.xlu0 %v101_v0, %s131_s10  ;;  %19 = vrot.lane.b32.xlu1 %v103_v1, %s132_s11  ;;  %v104_v3 = vld [vmem:[%s207_s0 + $0xc] sm:$0x1]   ;;  %s133_s16 = smov 112   ;;  %s134_s17 = smov 96   ;;  %v105_v4 = vld [vmem:[%s207_s0 + $0xb] sm:$0x1]  }
   0x3   :  { %v106_v5 = vld [vmem:[%s207_s0 + $0xa] sm:$0x1]   ;;  %v2_v6 = vld [vmem:[%s207_s0] sm:$0x1]   ;;  %s135_s24 = smov 88   ;;  %s136_s25 = smov 80  }
   0x4   :  { %4 = vst.msk [vmem:[#allocation0] sm:$0x1] %vm3_vm0, %v2_v6   ;;  %v107_v7 = vld [vmem:[%s207_s0 + $0x9] sm:$0x1]   ;;  %v108_v8 = vld [vmem:[%s207_s0 + $0x8] sm:$0x1]  }
   0x5   :  { %s137_s30 = smov 72   ;;  %s138_s2 = smov 64   ;;  %v109_v9 = vld [vmem:[%s207_s0 + $0x7] sm:$0x1]   ;;  %v110_v10 = vld [vmem:[%s207_s0 + $0x6] sm:$0x1]  }
   0x6   :  { %13 = vrot.lane.b32.xlu0 %v102_v2, %s133_s16  ;;  %25 = vrot.lane.b32.xlu1 %v104_v3, %s134_s17  ;;  %s139_s7 = smov 56   ;;  %s140_s8 = smov 48   ;;  %v111_v11 = vld [vmem:[%s207_s0 + $0x5] sm:$0x1]   ;;  %v112_v12 = vld [vmem:[%s207_s0 + $0x4] sm:$0x1]  }
   0x7   :  { %s141_s13 = smov 40   ;;  %s142_s14 = smov 32   ;;  %v113_v13 = vld [vmem:[%s207_s0 + $0x3] sm:$0x1]   ;;  %v114_v14 = vld [vmem:[%s207_s0 + $0x2] sm:$0x1]  }
   0x8   :  { %s143_s19 = smov 24   ;;  %s144_s20 = smov 16   ;;  %v115_v15 = vld [vmem:[%s207_s0 + $0x1] sm:$0x1]   ;;  %vm27_vm4 = vcmask 851712   ;;  %vm33_vm5 = vcmask 786112  }
   0x9   :  { %s145_s0 = smov 8   ;;  %vm39_vm6 = vcmask 720512   ;;  %vm45_vm7 = vcmask 654912   ;;  %vm51_vm8 = vcmask 589312   ;;  %vm57_vm9 = vcmask 523712  }
   0xa   :  { %31 = vrot.lane.b32.xlu0 %v105_v4, %s135_s24  ;;  %37 = vrot.lane.b32.xlu1 %v106_v5, %s136_s25  ;;  %vm63_vm10 = vcmask 458112   ;;  %vm69_vm11 = vcmask 392512   ;;  %vm75_vm12 = vcmask 326912   ;;  %vm81_vm13 = vcmask 261312  }
   0xb   :  { %vm87_vm14 = vcmask 195712   ;;  %vm93_vm15 = vcmask 130112  }
   0xe   :  { %43 = vrot.lane.b32.xlu0 %v107_v7, %s137_s30  ;;  %49 = vrot.lane.b32.xlu1 %v108_v8, %s138_s2 }
  0x12   :  { %55 = vrot.lane.b32.xlu0 %v109_v9, %s139_s7  ;;  %61 = vrot.lane.b32.xlu1 %v110_v10, %s140_s8 }
  0x16   :  { %67 = vrot.lane.b32.xlu0 %v111_v11, %s141_s13  ;;  %73 = vrot.lane.b32.xlu1 %v112_v12, %s142_s14 }
  0x1a   :  { %79 = vrot.lane.b32.xlu0 %v113_v13, %s143_s19  ;;  %85 = vrot.lane.b32.xlu1 %v114_v14, %s144_s20 }
  0x1e   :  { %91 = vrot.lane.b32.xlu0 %v115_v15, %s145_s0 }
  0x74   :  { %v8_v16 = vpop.permute.xlu0 %7   ;;  %v20_v17 = vpop.permute.xlu1 %19  }
  0x75   :  { %10 = vst.msk [vmem:[#allocation0] sm:$0x1] %vm9_vm1, %v8_v16  }
  0x78   :  { %v14_v18 = vpop.permute.xlu0 %13   ;;  %v26_v19 = vpop.permute.xlu1 %25  }
  0x79   :  { %16 = vst.msk [vmem:[#allocation0] sm:$0x1] %vm15_vm2, %v14_v18  }
  0x7a   :  { %22 = vst.msk [vmem:[#allocation0] sm:$0x1] %vm21_vm3, %v20_v17  }
  0x7b   :  { %28 = vst.msk [vmem:[#allocation0] sm:$0x1] %vm27_vm4, %v26_v19  }
  0x7c   :  { %v32_v20 = vpop.permute.xlu0 %31   ;;  %v38_v21 = vpop.permute.xlu1 %37  }
  0x7d   :  { %34 = vst.msk [vmem:[#allocation0] sm:$0x1] %vm33_vm5, %v32_v20  }
  0x7e   :  { %40 = vst.msk [vmem:[#allocation0] sm:$0x1] %vm39_vm6, %v38_v21  }
  0x80   :  { %v44_v22 = vpop.permute.xlu0 %43   ;;  %v50_v23 = vpop.permute.xlu1 %49  }
  0x81   :  { %46 = vst.msk [vmem:[#allocation0] sm:$0x1] %vm45_vm7, %v44_v22  }
  0x82   :  { %52 = vst.msk [vmem:[#allocation0] sm:$0x1] %vm51_vm8, %v50_v23  }
  0x84   :  { %v56_v24 = vpop.permute.xlu0 %55   ;;  %v62_v25 = vpop.permute.xlu1 %61  }
  0x85   :  { %58 = vst.msk [vmem:[#allocation0] sm:$0x1] %vm57_vm9, %v56_v24  }
  0x86   :  { %64 = vst.msk [vmem:[#allocation0] sm:$0x1] %vm63_vm10, %v62_v25  }
  0x88   :  { %v68_v26 = vpop.permute.xlu0 %67   ;;  %v74_v27 = vpop.permute.xlu1 %73  }
  0x89   :  { %70 = vst.msk [vmem:[#allocation0] sm:$0x1] %vm69_vm11, %v68_v26  }
  0x8a   :  { %76 = vst.msk [vmem:[#allocation0] sm:$0x1] %vm75_vm12, %v74_v27  }
  0x8c   :  { %v80_v28 = vpop.permute.xlu0 %79   ;;  %v86_v29 = vpop.permute.xlu1 %85  }
  0x8d   :  { %82 = vst.msk [vmem:[#allocation0] sm:$0x1] %vm81_vm13, %v80_v28  }
  0x8e   :  { %88 = vst.msk [vmem:[#allocation0] sm:$0x1] %vm87_vm14, %v86_v29  }
  0x90   :  { %v92_v30 = vpop.permute.xlu0 %91  }
  0x91   :  { %94 = vst.msk [vmem:[#allocation0] sm:$0x1] %vm93_vm15, %v92_v30  }
  0x98   :  { %v98_v31 = vld [vmem:[#allocation0] sm:$0x1] }
  0x99   :  { %100 = vst [vmem:[%s208_s1] sm:$0x1] %v98_v31 }

// kernel: block_forward.1
= control target key start
LH: loop header
LB: loop body
LE: loop exit
PB: predicated region body
PF: predicated region fallthrough
CT: control target
= control target key end

     0   :  { %s1344_s18 = smov 0   ;;  %s1592_s0 = inlined_call_operand.vmem [shape: f32[2,16,48], index: 0, kind: input, shape index: {}]   ;;  %s1593_s1 = inlined_call_operand.vmem [shape: f32[3,48,128], index: 1, kind: input, shape index: {}]   ;;  %s1594_s2 = inlined_call_operand.vmem [shape: f32[1,128], index: 2, kind: input, shape index: {}]   ;;  %s1595_s3 = inlined_call_operand.vmem [shape: f32[3,128,128], index: 3, kind: input, shape index: {}]   ;;  %s1596_s4 = inlined_call_operand.vmem [shape: f32[1,128], index: 4, kind: input, shape index: {}]   ;;  %s1597_s5 = inlined_call_operand.vmem [shape: f32[2,12,128], index: 5, kind: output, shape index: {}]  }
   0x1 LB: > { %s865_s19 = sadd.s32 4294967295, %s1312_s18   ;;  %p869_p0 = scmp.ge.s32.totalorder %s1312_s18, 1  ;;  %s1312_s18 = sphi %s1344_s18, %s15_s18  }
   0x2   : > { %p187_p1 = scmp.lt.s32.totalorder %s1312_s18, 3 }
   0x4   : > { %p188_p2 = pnand %p869_p0, %p187_p1 }
   0x5   : > { %v874_v0 = vld [vmem:[%s1593_s1 + $0x30] sm:$0xff] (!%p188_p2)  ;;  %v875_v1 = vld [vmem:[%s1593_s1 + $0x38] sm:$0xff] (!%p188_p2)  ;;  %v876_v2 = vld [vmem:[%s1593_s1 + $0x40] sm:$0xff] (!%p188_p2)  ;;  %p215_p3 = scmp.lt.s32.totalorder (!%p188_p2), %s865_s19, 1  ;;  %vm242_vm0 = vcmask (!%p188_p2), 1046528   ;;  %vm246_vm1 = vcmask (!%p188_p2), 392192  }
   0x6   : > { %191 = sbr.rel (%p188_p2) target bundleno = 515 (0x203), region = 40  ;;  %v1158_v3 = vpack.c.bf16 (!%p188_p2), %v875_v1, %v874_v0  ;;  %v877_v4 = vld [vmem:[%s1593_s1 + $0x48] sm:$0xff] (!%p188_p2)  ;;  %v878_v6 = vld [vmem:[%s1593_s1 + $0x50] sm:$0xff] (!%p188_p2)  ;;  %v879_v7 = vld [vmem:[%s1593_s1 + $0x58] sm:$0xff] (!%p188_p2)  ;;  %vm412_vm2 = vcmask (!%p188_p2), 1045504  }
   0x7   : > { %v1162_v5 = vpack.c.bf16 (!%p188_p2), %v877_v4, %v876_v2  ;;  %v1166_v8 = vpack.c.bf16 (!%p188_p2), %v879_v7, %v878_v6  ;;  %v227_v9 = vld [vmem:[%s1593_s1] sm:$0xff] (!%p188_p2)  ;;  %v228_v10 = vld [vmem:[%s1593_s1 + $0x8] sm:$0xff] (!%p188_p2)  ;;  %v510_v18 = vld [vmem:[%s1595_s3 + $0x10] sm:$0xff] (!%p188_p2) }
   0x8   : > { %1159 = vmatprep.subr.bf16.mxu0 (!%p188_p2), %v1158_v3  ;;  %v508_v13 = vld [vmem:[%s1595_s3] sm:$0xff] (!%p188_p2)  ;;  %v509_v16 = vld [vmem:[%s1595_s3 + $0x8] sm:$0xff] (!%p188_p2)  ;;  %v511_v19 = vld [vmem:[%s1595_s3 + $0x18] sm:$0xff] (!%p188_p2)  ;;  %v1170_v21 = vpack.c.bf16 (!%p188_p2), %v228_v10, %v227_v9 }
   0x9   : > { %1161 = vmatpush3.bf16.msra.mxu0 (!%p188_p2), %v1158_v3  ;;  %v1226_v17 = vpack.c.bf16 (!%p188_p2), %v509_v16, %v508_v13  ;;  %v229_v22 = vld [vmem:[%s1593_s1 + $0x10] sm:$0xff] (!%p188_p2)  ;;  %v1230_v23 = vpack.c.bf16 (!%p188_p2), %v511_v19, %v510_v18  ;;  %v230_v24 = vld [vmem:[%s1593_s1 + $0x18] sm:$0xff] (!%p188_p2)  ;;  %v512_v25 = vld [vmem:[%s1595_s3 + $0x20] sm:$0xff] (!%p188_p2) }
   0xa   : > { %1163 = vmatprep.subr.bf16.mxu0 (!%p188_p2), %v1162_v5  ;;  %v513_v26 = vld [vmem:[%s1595_s3 + $0x28] sm:$0xff] (!%p188_p2)  ;;  %v1174_v27 = vpack.c.bf16 (!%p188_p2), %v230_v24, %v229_v22  ;;  %v514_v29 = vld [vmem:[%s1595_s3 + $0x30] sm:$0xff] (!%p188_p2)  ;;  %v515_v30 = vld [vmem:[%s1595_s3 + $0x38] sm:$0xff] (!%p188_p2) }
   0xb   : > { %1227 = vmatprep.subr.bf16.mxu1 (!%p188_p2), %v1226_v17  ;;  %v1234_v28 = vpack.c.bf16 (!%p188_p2), %v513_v26, %v512_v25  ;;  %v231_v31 = vld [vmem:[%s1593_s1 + $0x20] sm:$0xff] (!%p188_p2)  ;;  %v232_v32 = vld [vmem:[%s1593_s1 + $0x28] sm:$0xff] (!%p188_p2)  ;;  %v1238_v33 = vpack.c.bf16 (!%p188_p2), %v515_v30, %v514_v29  ;;  %v886_v41 = vld [vmem:[%s1593_s1 + $0x70] sm:$0xff] (!%p188_p2) }
   0xc   : > { %1229 = vmatpush3.bf16.msra.mxu1 (!%p188_p2), %v1226_v17  ;;  %v1178_v34 = vpack.c.bf16 (!%p188_p2), %v232_v32, %v231_v31  ;;  %v516_v35 = vld [vmem:[%s1595_s3 + $0x40] sm:$0xff] (!%p188_p2)  ;;  %v517_v36 = vld [vmem:[%s1595_s3 + $0x48] sm:$0xff] (!%p188_p2)  ;;  %v887_v44 = vld [vmem:[%s1593_s1 + $0x78] sm:$0xff] (!%p188_p2) }
   0xd   : > { %s1599_s19 = smov (!%p215_p3, %s865_s19), 1  ;;  %1165 = vmatpush3.bf16.msra.mxu0 %v1162_v5  ;;  %1231 = vmatprep.subr.bf16.mxu1 %v1230_v23  ;;  %v884_v37 = vld [vmem:[%s1593_s1 + $0x60] sm:$0xff]  ;;  %v885_v38 = vld [vmem:[%s1593_s1 + $0x68] sm:$0xff]  ;;  %v1242_v39 = vpack.c.bf16 %v517_v36, %v516_v35  ;;  %v518_v45 = vld [vmem:[%s1595_s3 + $0x50] sm:$0xff]  ;;  %v1186_v47 = vpack.c.bf16 %v887_v44, %v886_v41 }
   0xe   : > { %s928_s7 = sshll.u32 %s1599_s19, 4  ;;  %1167 = vmatprep.subr.bf16.mxu0 %v1166_v8  ;;  %v1182_v40 = vpack.c.bf16 %v885_v38, %v884_v37  ;;  %v519_v46 = vld [vmem:[%s1595_s3 + $0x58] sm:$0xff]  ;;  %v520_v50 = vld [vmem:[%s1595_s3 + $0x60] sm:$0xff]  ;;  %v521_v51 = vld [vmem:[%s1595_s3 + $0x68] sm:$0xff] }
   0xf   : > { %s219_s10 = scalar_lea.vmem %s1592_s0, %s928_s7  ;;  %v1246_v49 = vpack.c.bf16 %v519_v46, %v518_v45  ;;  %v888_v52 = vld [vmem:[%s1593_s1 + $0x80] sm:$0xff]  ;;  %v889_v53 = vld [vmem:[%s1593_s1 + $0x88] sm:$0xff]  ;;  %v1250_v54 = vpack.c.bf16 %v521_v51, %v520_v50  ;;  %v895_v59 = vld [vmem:[%s1595_s3 + $0x90] sm:$0xff]  ;;  %s224_s29 = scalar_lea.vmem %s1597_s5, %s928_s7 }
  0x10   : > { %v1384_v11 = vld [vmem:[%s219_s10] sm:$0xff]  ;;  %v1386_v12 = vld [vmem:[%s219_s10 + $0x8] sm:$0xff]  ;;  %1233 = vmatpush3.bf16.msra.mxu1 %v1230_v23  ;;  %v1190_v55 = vpack.c.bf16 %v889_v53, %v888_v52  ;;  %v896_v60 = vld [vmem:[%s1595_s3 + $0x98] sm:$0xff] }
  0x11   : > { %v243_v14 = vrot.slane %v1384_v11, 1  ;;  %v244_v15 = vrot.slane %v1386_v12, 1  ;;  %1169 = vmatpush3.bf16.msra.mxu0 %v1166_v8  ;;  %1235 = vmatprep.subr.bf16.mxu1 %v1234_v28  ;;  %v413_v42 = vrot.slane %v1384_v11, 2  ;;  %v414_v43 = vrot.slane %v1386_v12, 2  ;;  %v893_v56 = vld [vmem:[%s1595_s3 + $0x80] sm:$0xff]  ;;  %v894_v57 = vld [vmem:[%s1595_s3 + $0x88] sm:$0xff] }
  0x12   : > { %1171 = vmatprep.subr.bf16.mxu0 %v1170_v21  ;;  %v1194_v58 = vpack.c.bf16 %v894_v57, %v893_v56  ;;  %v1198_v61 = vpack.c.bf16 %v896_v60, %v895_v59  ;;  %v897_v62 = vld [vmem:[%s1595_s3 + $0xa0] sm:$0xff]  ;;  %v898_v63 = vld [vmem:[%s1595_s3 + $0xa8] sm:$0xff]  ;;  %v899_v1 = vld [vmem:[%s1595_s3 + $0xb0] sm:$0xff] }
  0x13   : > { %v245_v20 = vsel %vm242_vm0, %v243_v14, %v244_v15  ;;  %v415_v48 = vsel %vm412_vm2, %v413_v42, %v414_v43  ;;  %v1202_v0 = vpack.c.bf16 %v898_v63, %v897_v62  ;;  %v900_v2 = vld [vmem:[%s1595_s3 + $0xb8] sm:$0xff]  ;;  %v901_v4 = vld [vmem:[%s1595_s3 + $0xc0] sm:$0xff]  ;;  %v902_v5 = vld [vmem:[%s1595_s3 + $0xc8] sm:$0xff] }
  0x14   : > { %1020 = vmatprep.mubr.msk.f32.mxu0 %vm246_vm1, %v245_v20  ;;  %1237 = vmatpush3.bf16.msra.mxu1 %v1234_v28  ;;  %v1206_v3 = vpack.c.bf16 %v900_v2, %v899_v1  ;;  %v1210_v6 = vpack.c.bf16 %v902_v5, %v901_v4  ;;  %v903_v7 = vld [vmem:[%s1595_s3 + $0xd0] sm:$0xff]  ;;  %v904_v8 = vld [vmem:[%s1595_s3 + $0xd8] sm:$0xff]  ;;  %v905_v10 = vld [vmem:[%s1595_s3 + $0xe0] sm:$0xff] }
  0x15   : > { %1021 = vmatmul.mubr.msk.f32.vlgmr.msra.gmra.mrb[0].mxu0 %vm246_vm1, %v244_v15  ;;  %1239 = vmatprep.subr.bf16.mxu1 %v1238_v33  ;;  %v1214_v9 = vpack.c.bf16 %v904_v8, %v903_v7  ;;  %v523_v14 = vld [vmem:[%s1595_s3 + $0x78] sm:$0xff]  ;;  %v907_v16 = vld [vmem:[%s1595_s3 + $0xf0] sm:$0xff]  ;;  %v909_v18 = vld [vmem:[%s1595_s3 + $0x100] sm:$0xff] }
  0x16   : > { %1173 = vmatpush3.bf16.msra.mxu0 %v1170_v21  ;;  %1035 = vmatprep.mubr.msk.f32.mxu0 %vm246_vm1, %v1384_v11  ;;  %v906_v11 = vld [vmem:[%s1595_s3 + $0xe8] sm:$0xff]  ;;  %v908_v17 = vld [vmem:[%s1595_s3 + $0xf8] sm:$0xff]  ;;  %v892_v22 = vld [vmem:[%s1594_s2] ss:$0 sm:$0xff] }
  0x17   : > { %1175 = vmatprep.subr.bf16.mxu0 %v1174_v27  ;;  %v1218_v13 = vpack.c.bf16 %v906_v11, %v905_v10  ;;  %v1222_v19 = vpack.c.bf16 %v908_v17, %v907_v16  ;;  %v910_v20 = vld [vmem:[%s1595_s3 + $0x108] sm:$0xff]  ;;  %v911_v28 = vld [vmem:[%s1595_s3 + $0x110] sm:$0xff]  ;;  %v912_v29 = vld [vmem:[%s1595_s3 + $0x118] sm:$0xff] }
  0x18   : > { %1241 = vmatpush3.bf16.msra.mxu1 %v1238_v33  ;;  %v1258_v21 = vpack.c.bf16 %v910_v20, %v909_v18  ;;  %v1262_v35 = vpack.c.bf16 %v912_v29, %v911_v28  ;;  %v913_v36 = vld [vmem:[%s1595_s3 + $0x120] sm:$0xff]  ;;  %v914_v37 = vld [vmem:[%s1595_s3 + $0x128] sm:$0xff]  ;;  %v915_v41 = vld [vmem:[%s1595_s3 + $0x130] sm:$0xff] }
  0x19   : > { %1243 = vmatprep.subr.bf16.mxu1 %v1242_v39  ;;  %v916_v42 = vld [vmem:[%s1595_s3 + $0x138] sm:$0xff]  ;;  %v917_v44 = vld [vmem:[%s1595_s3 + $0x140] sm:$0xff]  ;;  %v918_v45 = vld [vmem:[%s1595_s3 + $0x148] sm:$0xff] }
  0x1a   : > { %1177 = vmatpush3.bf16.msra.mxu0 %v1174_v27  ;;  %v1274_v46 = vpack.c.bf16 %v918_v45, %v917_v44  ;;  %v921_v50 = vld [vmem:[%s1595_s3 + $0x160] sm:$0xff]  ;;  %v922_v51 = vld [vmem:[%s1595_s3 + $0x168] sm:$0xff]  ;;  %v923_v53 = vld [vmem:[%s1595_s3 + $0x170] sm:$0xff] }
  0x1b   : > { %1179 = vmatprep.subr.bf16.mxu0 %v1178_v34  ;;  %v1282_v52 = vpack.c.bf16 %v922_v51, %v921_v50  ;;  %v925_v59 = vld [vmem:[%s1596_s4] ss:$0 sm:$0xff] }
  0x1c   : > { %1245 = vmatpush3.bf16.msra.mxu1 %v1242_v39 }
  0x1d   : > { %1247 = vmatprep.subr.bf16.mxu1 %v1246_v49 }
  0x1e   : > { %1181 = vmatpush3.bf16.msra.mxu0 %v1178_v34 }
  0x1f   : > { %1183 = vmatprep.subr.bf16.mxu0 %v1182_v40 }
  0x20   : > { %1249 = vmatpush3.bf16.msra.mxu1 %v1246_v49 }
  0x21   : > { %1036 = vmatmul.mubr.msk.f32.vlgmr.msra.gmra.mrb[0].mxu0 %vm246_vm1, %v1386_v12  ;;  %1251 = vmatprep.subr.bf16.mxu1 %v1250_v54  ;;  %v522_v12 = vld [vmem:[%s1595_s3 + $0x70] sm:$0xff] }
  0x22   : > { %1185 = vmatpush3.bf16.msra.mxu0 %v1182_v40  ;;  %1050 = vmatprep.mubr.msk.f32.mxu0 %vm246_vm1, %v415_v48  ;;  %v1254_v15 = vpack.c.bf16 %v523_v14, %v522_v12  ;;  %v1266_v40 = vpack.c.bf16 %v914_v37, %v913_v36  ;;  %v920_v48 = vld [vmem:[%s1595_s3 + $0x158] sm:$0xff] }
  0x23   : > { %1187 = vmatprep.subr.bf16.mxu0 %v1186_v47 }
  0x24   : > { %1253 = vmatpush3.bf16.msra.mxu1 %v1250_v54  ;;  %v924_v54 = vld [vmem:[%s1595_s3 + $0x178] sm:$0xff] }
  0x25   : > { %1255 = vmatprep.subr.bf16.mxu1 %v1254_v15 }
  0x26   : > { %1189 = vmatpush3.bf16.msra.mxu0 %v1186_v47  ;;  %v919_v47 = vld [vmem:[%s1595_s3 + $0x150] sm:$0xff] }
  0x27   : > { %1191 = vmatprep.subr.bf16.mxu0 %v1190_v55  ;;  %v1278_v49 = vpack.c.bf16 %v920_v48, %v919_v47 }
  0x28   : > { %1257 = vmatpush3.bf16.msra.mxu1 %v1254_v15 }
  0x29   : > { %1259 = vmatprep.subr.bf16.mxu1 %v1258_v21 }
  0x2a   : > { %1193 = vmatpush3.bf16.msra.mxu0 %v1190_v55  ;;  %v1286_v55 = vpack.c.bf16 %v924_v54, %v923_v53 }
  0x2b   : > { %1195 = vmatprep.subr.bf16.mxu0 %v1194_v58 }
  0x2d   : > { %1051 = vmatmul.mubr.msk.f32.vlgmr.msra.gmra.mrb[0].mxu0 %vm246_vm1, %v414_v43  ;;  %v1270_v43 = vpack.c.bf16 %v916_v42, %v915_v41 }
  0x2e   : > { %1197 = vmatpush3.bf16.msra.mxu0 %v1194_v58 }
  0x2f   : > { %1199 = vmatprep.subr.bf16.mxu0 %v1198_v61 }
  0x32   : > { %1201 = vmatpush3.bf16.msra.mxu0 %v1198_v61 }
  0x33   : > { %1203 = vmatprep.subr.bf16.mxu0 %v1202_v0 }
  0x36   : > { %1205 = vmatpush3.bf16.msra.mxu0 %v1202_v0 }
  0x37   : > { %1207 = vmatprep.subr.bf16.mxu0 %v1206_v3 }
  0x3a   : > { %1209 = vmatpush3.bf16.msra.mxu0 %v1206_v3 }
  0x3b   : > { %1211 = vmatprep.subr.bf16.mxu0 %v1210_v6 }
  0x3e   : > { %1213 = vmatpush3.bf16.msra.mxu0 %v1210_v6 }
  0x3f   : > { %1215 = vmatprep.subr.bf16.mxu0 %v1214_v9 }
  0x42   : > { %1217 = vmatpush3.bf16.msra.mxu0 %v1214_v9 }
  0x43   : > { %1219 = vmatprep.subr.bf16.mxu0 %v1218_v13 }
  0x46   : > { %1221 = vmatpush3.bf16.msra.mxu0 %v1218_v13 }
  0x47   : > { %1223 = vmatprep.subr.bf16.mxu0 %v1222_v19 }
  0x4a   : > { %1225 = vmatpush3.bf16.msra.mxu0 %v1222_v19 }
 0x100   : > { %v1052_v23 = vpop.f32.mrb[0].mxu0 }
 0x101   : > { %v505_v24 = vadd.f32 %v1052_v23, %v892_v22  ;;  %v486_v25 = vpop.f32.mrb[1].mxu0 }
 0x102   : > { %v504_v26 = vadd.f32 %v892_v22, %v486_v25 }
 0x103   : > { %v507_v27 = vmax.f32 %v505_v24, 0.0 }
 0x104   : > { %v506_v30 = vmax.f32 %v504_v26, 0.0 }
 0x105   : > { %v544_v31 = vrot.slane %v507_v27, 1  ;;  %v716_v32 = vrot.slane %v507_v27, 2 }
 0x106   : > { %v543_v33 = vrot.slane %v506_v30, 1  ;;  %v715_v34 = vrot.slane %v506_v30, 2  ;;  %1120 = vmatprep.mubr.f32.mxu1 %v506_v30 }
 0x107   : > { %1121 = vmatmul.mubr.f32.vlgmr.msra.gmra.mrb[0].mxu1 %v507_v27 }
 0x108   : > { %1261 = vmatpush3.bf16.msra.mxu1 %v1258_v21  ;;  %v545_v38 = vsel %vm242_vm0, %v543_v33, %v544_v31  ;;  %v717_v39 = vsel %vm412_vm2, %v715_v34, %v716_v32 }
 0x109   : > { %1085 = vmatprep.mubr.f32.mxu0 %v545_v38  ;;  %1155 = vmatprep.mubr.f32.mxu1 %v717_v39 }
 0x10a   : > { %1086 = vmatmul.mubr.f32.vlgmr.msra.gmra.mrb[2].mxu0 %v544_v31  ;;  %1263 = vmatprep.subr.bf16.mxu1 %v1262_v35 }
 0x10c   : > { %1265 = vmatpush3.bf16.msra.mxu1 %v1262_v35 }
 0x10d   : > { %1267 = vmatprep.subr.bf16.mxu1 %v1266_v40 }
 0x110   : > { %1269 = vmatpush3.bf16.msra.mxu1 %v1266_v40 }
 0x111   : > { %1271 = vmatprep.subr.bf16.mxu1 %v1270_v43 }
 0x114   : > { %1273 = vmatpush3.bf16.msra.mxu1 %v1270_v43 }
 0x115   : > { %1275 = vmatprep.subr.bf16.mxu1 %v1274_v46 }
 0x118   : > { %1277 = vmatpush3.bf16.msra.mxu1 %v1274_v46 }
 0x119   : > { %1279 = vmatprep.subr.bf16.mxu1 %v1278_v49 }
 0x11c   : > { %1281 = vmatpush3.bf16.msra.mxu1 %v1278_v49 }
 0x11d   : > { %1283 = vmatprep.subr.bf16.mxu1 %v1282_v52 }
 0x120   : > { %1285 = vmatpush3.bf16.msra.mxu1 %v1282_v52 }
 0x121   : > { %1287 = vmatprep.subr.bf16.mxu1 %v1286_v55 }
 0x124   : > { %1289 = vmatpush3.bf16.msra.mxu1 %v1286_v55 }
 0x127   : > { %1156 = vmatmul.mubr.f32.vlgmr.msra.gmra.mrb[0].mxu1 %v716_v32 }
 0x1dd   : > { %v1087_v56 = vpop.f32.mrb[2].mxu0 }
 0x1de   : > { %v614_v57 = vpop.f32.mrb[3].mxu0 }
 0x1fa   : > { %v1157_v58 = vpop.f32.mrb[0].mxu1 }
 0x1fb   : > { %v1290_v60 = vadd.f32 %v1157_v58, %v1087_v56  ;;  %v786_v61 = vpop.f32.mrb[1].mxu1 }
 0x1fc   : > { %v1291_v62 = vadd.f32 %v786_v61, %v614_v57 }
 0x1fd   : > { %v805_v63 = vadd.f32 %v1290_v60, %v925_v59 }
 0x1fe   : > { %v804_v0 = vadd.f32 %v1291_v62, %v925_v59 }
 0x1ff   : > { %v807_v1 = vmax.f32 %v805_v63, 0.0 }
 0x200   : > { %v806_v2 = vmax.f32 %v804_v0, 0.0 }
 0x201   : > { %809 = vst [vmem:[%s224_s29 + $0x8] sm:$0xf] %v807_v1 }
 0x202   : > { %808 = vst [vmem:[%s224_s29] sm:$0xff] %v806_v2 }
 0x203 PF: > { %s15_s18 = sadd.s32 1, %s1312_s18  }
 0x204   : > { %p12_p4 = scmp.ge.s32.totalorder %s15_s18, 4  }
 0x206   :  { %14 = sbr.rel (!%p12_p4) target bundleno = 1 (0x1), region = 74 }

</bundles_post_ra>
